<compile_context>
chip_gen: v7x
topology: tpu7x:2x2x1
jax: 0.10.0
libtpu: 0.0.40
codegen_flags: <defaults>
</compile_context>

<pallas_src>
import functools

import jax
import jax.numpy as jnp
from jax import lax
from jax.experimental import pallas as pl
from jax.experimental.pallas import tpu as pltpu

_FULL_UNROLL_MAX = 16   # fully unroll the in-kernel time loop up to this chunk
_UNROLL = 8             # otherwise unroll-by-8 inside a rolled fori_loop


def _round_up(n, m):
    return ((n + m - 1) // m) * m


def _pad_to(arr, axis, target):
    size = arr.shape[axis]
    if size == target:
        return arr
    widths = [(0, 0)] * arr.ndim
    widths[axis] = (0, target - size)
    return jnp.pad(arr, widths)


def _physical_vmem_bytes():
    """Per-core physical VMEM; conservative (v7x = 64 MiB) fallback if unknown."""
    try:
        info = pltpu.get_tpu_info()
        v = getattr(info, "vmem_capacity_bytes", None)
        if v:
            return int(v)
    except Exception:
        pass
    return 64 << 20


def _pick_time_chunk(T, max_tc):
    """Largest divisor of T whose double-buffered pre chunk fits the budget."""
    best = 1
    for c in range(1, T + 1):
        if T % c == 0 and c <= max_tc:
            best = c
    return best


def _const_spec(shape, weight_buffers):
    """BlockSpec for a grid-invariant (constant-block) input."""
    index_map = lambda *_: (0,) * len(shape)
    if weight_buffers is None:
        return pl.BlockSpec(shape, index_map)
    return pl.BlockSpec(shape, index_map,
                        pipeline_mode=pl.Buffered(weight_buffers))


def rnn_recurrence_kernel(pre_ref, whh_ref, wfc_ref, bfc_ref, out_ref, h_ref):
    ct = pl.program_id(1)            # time-chunk index (innermost, serial)

    # h0 = zeros (matches the torch.zeros(...) h0), per batch tile.
    @pl.when(ct == 0)
    def _():
        h_ref[...] = jnp.zeros_like(h_ref)

    whh = whh_ref[...]               # (Hp, Hp) bf16 = W_hh^T, loop-invariant
    tc = pre_ref.shape[0]            # timesteps in this chunk (static)

    def cell(h, pre_t):
        # h_t = tanh(pre_t + h_{t-1} @ W_hh^T); matmul in bf16 with f32
        # accumulation, add + tanh strictly in f32 (VPU/EUP).
        z = jnp.dot(h.astype(jnp.bfloat16), whh,
                    preferred_element_type=jnp.float32)
        return jnp.tanh(pre_t.astype(jnp.float32) + z)

    h = h_ref[...]                   # (Bt, Hp) f32 carried hidden state
    if tc <= _FULL_UNROLL_MAX:
        # Short fixed chunk: fully unrolled straight-line code.
        for i in range(tc):
            h = cell(h, pre_ref[i])
    else:
        # Longer chunk: rolled loop over groups, unrolled by _UNROLL inside.
        n_groups = tc // _UNROLL

        def body(g, h):
            base = pl.multiple_of(g * _UNROLL, _UNROLL)
            for u in range(_UNROLL):
                h = cell(h, pre_ref[base + u])
            return h

        h = lax.fori_loop(0, n_groups, body, h)
        for i in range(n_groups * _UNROLL, tc):   # remainder (empty if divisible)
            h = cell(h, pre_ref[i])
    h_ref[...] = h

    # FC head exactly once per batch tile, while h_T is still in VMEM.
    @pl.when(ct == pl.num_programs(1) - 1)
    def _():
        out_ref[...] = (
            jnp.dot(h.astype(jnp.bfloat16), wfc_ref[...],
                    preferred_element_type=jnp.float32)
            + bfc_ref[...]
        ).astype(out_ref.dtype)


def rnn_model_forward(x, w_ih, w_hh, b_ih, b_hh, w_fc, b_fc, weight_buffers=1):
    """x: (B, T, I) float32 (batch_first) -> (B, O), matching RNNmodel.forward."""
    B, T, I = x.shape
    H = w_ih.shape[0]
    O = w_fc.shape[0]

    # ---- pad to TPU-friendly shapes (zero padding is exact, see header) ----
    Bp = _round_up(B, 16)      # bf16 sublane packing for the streamed pre
    Hp = _round_up(H, 128)     # lane width / MXU
    Op = _round_up(O, 128)     # lane-dense output store

    x_p = _pad_to(x, 0, Bp)                                     # (Bp, T, I)
    w_ih_p = _pad_to(w_ih, 0, Hp)                               # (Hp, I)
    w_hh_p = _pad_to(_pad_to(w_hh, 0, Hp), 1, Hp)               # (Hp, Hp)
    b_p = _pad_to(b_ih + b_hh, 0, Hp)                           # (Hp,)
    w_fc_p = _pad_to(_pad_to(w_fc, 0, Op), 1, Hp)               # (Op, Hp)
    b_fc_p = _pad_to(b_fc, 0, Op)                               # (Op,)

    # ---- hoisted input projection: one tall bf16 MXU matmul, f32 accum ----
    # Emitted time-major (T, Bp, Hp) with both RNN biases folded in, then
    # cast to bf16: this is the only HBM-streamed tensor of the kernel.
    pre = jnp.einsum("bti,hi->tbh",
                     x_p.astype(jnp.bfloat16), w_ih_p.astype(jnp.bfloat16),
                     preferred_element_type=jnp.float32) + b_p
    pre = pre.astype(jnp.bfloat16)

    # ---- batch tiling ("parallel" axis -> 2 TensorCores on v7x) ----
    if Bp >= 256 and (Bp // 2) % 16 == 0:
        Bt = Bp // 2
    else:
        Bt = Bp
    n_btiles = Bp // Bt

    # ---- VMEM-aware time-chunk size and scoped-VMEM limit ----
    wb = 2 if weight_buffers is None else int(weight_buffers)
    bytes_bf16 = 2
    fixed_bytes = (wb * Hp * Hp * bytes_bf16        # W_hh^T
                   + wb * Hp * Op * bytes_bf16      # W_fc^T
                   + wb * Op * 4                    # b_fc
                   + 2 * Bt * Op * 4                # output tile (double-buffered)
                   + Bt * Hp * 4)                   # carried-h scratch
    phys = _physical_vmem_bytes()
    budget = int(phys * 0.75)                       # ~25% headroom
    pre_bytes_per_step = Bt * Hp * bytes_bf16
    max_tc = max(1, (budget - fixed_bytes) // (2 * pre_bytes_per_step))
    tc = _pick_time_chunk(T, max_tc)
    num_chunks = T // tc
    vmem_limit = min(phys,
                     max(32 << 20,
                         fixed_bytes + 2 * tc * pre_bytes_per_step + (4 << 20)))

    out_p = pl.pallas_call(
        rnn_recurrence_kernel,
        out_shape=jax.ShapeDtypeStruct((Bp, Op), jnp.float32),
        grid_spec=pltpu.PrefetchScalarGridSpec(
            num_scalar_prefetch=0,
            grid=(n_btiles, num_chunks),
            in_specs=[
                pl.BlockSpec((tc, Bt, Hp), lambda b, c: (c, b, 0)),  # pre (bf16)
                _const_spec((Hp, Hp), weight_buffers),               # W_hh^T (bf16)
                _const_spec((Hp, Op), weight_buffers),               # W_fc^T (bf16)
                _const_spec((1, Op), weight_buffers),                # b_fc (f32)
            ],
            out_specs=pl.BlockSpec((Bt, Op), lambda b, c: (b, 0)),
            scratch_shapes=[pltpu.VMEM((Bt, Hp), jnp.float32)],      # carried h
        ),
        compiler_params=pltpu.CompilerParams(
            dimension_semantics=("parallel", "arbitrary"),
            vmem_limit_bytes=int(vmem_limit),
        ),
    )(pre,
      jnp.transpose(w_hh_p).astype(jnp.bfloat16),
      jnp.transpose(w_fc_p).astype(jnp.bfloat16),
      b_fc_p.reshape(1, Op).astype(jnp.float32))

    return out_p[:B, :O]


def reference_forward(x, w_ih, w_hh, b_ih, b_hh, w_fc, b_fc):
    """Pure-JAX f32 reference mirroring the PyTorch module semantics."""
    B = x.shape[0]
    H = w_ih.shape[0]
    h = jnp.zeros((B, H), jnp.float32)

    def step(h, x_t):
        h_new = jnp.tanh(x_t @ w_ih.T + b_ih + h @ w_hh.T + b_hh)
        return h_new, None

    h_T, _ = jax.lax.scan(step, h, jnp.transpose(x, (1, 0, 2)))
    return h_T @ w_fc.T + b_fc


if __name__ == "__main__":
    # small, module-consistent shapes
    B, T, I, H, O = 2, 8, 16, 32, 8

    key = jax.random.PRNGKey(0)
    ks = jax.random.split(key, 7)
    bound = 1.0 / jnp.sqrt(H)   # PyTorch-style uniform(-1/sqrt(H), 1/sqrt(H))

    x = jax.random.normal(ks[0], (B, T, I), jnp.float32)
    w_ih = jax.random.uniform(ks[1], (H, I), jnp.float32, -bound, bound)
    w_hh = jax.random.uniform(ks[2], (H, H), jnp.float32, -bound, bound)
    b_ih = jax.random.uniform(ks[3], (H,), jnp.float32, -bound, bound)
    b_hh = jax.random.uniform(ks[4], (H,), jnp.float32, -bound, bound)
    w_fc = jax.random.uniform(ks[5], (O, H), jnp.float32, -bound, bound)
    b_fc = jax.random.uniform(ks[6], (O,), jnp.float32, -bound, bound)

    fwd = jax.jit(rnn_model_forward)
    try:
        out = jax.block_until_ready(fwd(x, w_ih, w_hh, b_ih, b_hh, w_fc, b_fc))
    except Exception:
        # Fallback if single-buffered invariant weights (pl.Buffered(1)) are
        # not supported by this Pallas build: default double-buffering.
        fwd = jax.jit(functools.partial(rnn_model_forward, weight_buffers=None))
        out = jax.block_until_ready(fwd(x, w_ih, w_hh, b_ih, b_hh, w_fc, b_fc))

    ref = reference_forward(x, w_ih, w_hh, b_ih, b_hh, w_fc, b_fc)
    assert out.shape == (B, O)
    # Kernel streams bf16 operands to the MXU (f32 accumulation), so compare
    # against the f32 reference at a bf16-appropriate tolerance.
    assert jnp.allclose(out, ref, atol=5e-2, rtol=5e-2), (out, ref)

    print("KERNEL_OK")
</pallas_src>

<mosaic_0001>
module attributes {stable_mosaic.version = 11 : i64} {
  func.func @rnn_recurrence_kernel(%arg0: i32, %arg1: i32, %arg2: memref<8x16x128xbf16, #tpu.memory_space<vmem>>, %arg3: memref<128x128xbf16, #tpu.memory_space<vmem>>, %arg4: memref<128x128xbf16, #tpu.memory_space<vmem>>, %arg5: memref<1x128xf32, #tpu.memory_space<vmem>>, %arg6: memref<16x128xf32, #tpu.memory_space<vmem>>, %arg7: memref<16x128xf32, #tpu.memory_space<vmem>>) attributes {dimension_semantics = [#tpu.dimension_semantics<parallel>, #tpu.dimension_semantics<arbitrary>], iteration_bounds = array<i64: 1, 1>, scalar_prefetch = 0 : i64, scratch_operands = 1 : i64, tpu.core_type = #tpu.core_type<tc>, window_params = [{transform_indices = @transform_0, window_bounds = array<i64: 8, 16, 128>}, {pipeline_mode = #tpu.pipeline_mode<synchronous>, transform_indices = @transform_1, window_bounds = array<i64: 128, 128>}, {pipeline_mode = #tpu.pipeline_mode<synchronous>, transform_indices = @transform_2, window_bounds = array<i64: 128, 128>}, {pipeline_mode = #tpu.pipeline_mode<synchronous>, transform_indices = @transform_3, window_bounds = array<i64: 1, 128>}, {transform_indices = @transform_4, window_bounds = array<i64: 16, 128>}]} {
    %c0_i32 = arith.constant 0 : i32
    %0 = arith.cmpi eq, %arg1, %c0_i32 : i32
    %1 = arith.extui %0 : i1 to i32
    %c0_i32_0 = arith.constant 0 : i32
    %2 = arith.cmpi ne, %1, %c0_i32_0 : i32
    scf.if %2 {
      %cst_32 = arith.constant 0.000000e+00 : f32
      %65 = vector.broadcast %cst_32 : f32 to vector<16x128xf32>
      %c0_33 = arith.constant 0 : index
      %c0_34 = arith.constant 0 : index
      %66 = vector.load %arg7[%c0_33, %c0_34] : memref<16x128xf32, #tpu.memory_space<vmem>>, vector<16x128xf32>
      tpu.vector_store %arg7[%c0_33, %c0_34], %65 {strides = array<i32>} : memref<16x128xf32, #tpu.memory_space<vmem>>, vector<16x128xf32>,
    } else {
    }
    %c0 = arith.constant 0 : index
    %c0_1 = arith.constant 0 : index
    %3 = vector.load %arg3[%c0, %c0_1] : memref<128x128xbf16, #tpu.memory_space<vmem>>, vector<128x128xbf16>
    %c0_2 = arith.constant 0 : index
    %c0_3 = arith.constant 0 : index
    %4 = vector.load %arg7[%c0_2, %c0_3] : memref<16x128xf32, #tpu.memory_space<vmem>>, vector<16x128xf32>
    %c0_4 = arith.constant 0 : index
    %c0_5 = arith.constant 0 : index
    %c0_6 = arith.constant 0 : index
    %5 = vector.load %arg2[%c0_4, %c0_5, %c0_6] : memref<8x16x128xbf16, #tpu.memory_space<vmem>>, vector<1x16x128xbf16>
    %6 = vector.shape_cast %5 : vector<1x16x128xbf16> to vector<16x128xbf16>
    %7 = arith.truncf %4 : vector<16x128xf32> to vector<16x128xbf16>
    %cst = arith.constant dense<0.000000e+00> : vector<16x128xf32>
    %8 = tpu.matmul %7, %3, %cst {dimension_numbers = #tpu.dot_dimension_numbers<[1], [0], [0], [1], [0, 0, 1, 1], [], []>} : vector<16x128xbf16>, vector<128x128xbf16>, vector<16x128xf32> -> vector<16x128xf32>
    %9 = arith.extf %6 : vector<16x128xbf16> to vector<16x128xf32>
    %10 = arith.addf %9, %8 : vector<16x128xf32>
    %11 = math.tanh %10 : vector<16x128xf32>
    %c1 = arith.constant 1 : index
    %c0_7 = arith.constant 0 : index
    %c0_8 = arith.constant 0 : index
    %12 = vector.load %arg2[%c1, %c0_7, %c0_8] : memref<8x16x128xbf16, #tpu.memory_space<vmem>>, vector<1x16x128xbf16>
    %13 = vector.shape_cast %12 : vector<1x16x128xbf16> to vector<16x128xbf16>
    %14 = arith.truncf %11 : vector<16x128xf32> to vector<16x128xbf16>
    %cst_9 = arith.constant dense<0.000000e+00> : vector<16x128xf32>
    %15 = tpu.matmul %14, %3, %cst_9 {dimension_numbers = #tpu.dot_dimension_numbers<[1], [0], [0], [1], [0, 0, 1, 1], [], []>} : vector<16x128xbf16>, vector<128x128xbf16>, vector<16x128xf32> -> vector<16x128xf32>
    %16 = arith.extf %13 : vector<16x128xbf16> to vector<16x128xf32>
    %17 = arith.addf %16, %15 : vector<16x128xf32>
    %18 = math.tanh %17 : vector<16x128xf32>
    %c2 = arith.constant 2 : index
    %c0_10 = arith.constant 0 : index
    %c0_11 = arith.constant 0 : index
    %19 = vector.load %arg2[%c2, %c0_10, %c0_11] : memref<8x16x128xbf16, #tpu.memory_space<vmem>>, vector<1x16x128xbf16>
    %20 = vector.shape_cast %19 : vector<1x16x128xbf16> to vector<16x128xbf16>
    %21 = arith.truncf %18 : vector<16x128xf32> to vector<16x128xbf16>
    %cst_12 = arith.constant dense<0.000000e+00> : vector<16x128xf32>
    %22 = tpu.matmul %21, %3, %cst_12 {dimension_numbers = #tpu.dot_dimension_numbers<[1], [0], [0], [1], [0, 0, 1, 1], [], []>} : vector<16x128xbf16>, vector<128x128xbf16>, vector<16x128xf32> -> vector<16x128xf32>
    %23 = arith.extf %20 : vector<16x128xbf16> to vector<16x128xf32>
    %24 = arith.addf %23, %22 : vector<16x128xf32>
    %25 = math.tanh %24 : vector<16x128xf32>
    %c3 = arith.constant 3 : index
    %c0_13 = arith.constant 0 : index
    %c0_14 = arith.constant 0 : index
    %26 = vector.load %arg2[%c3, %c0_13, %c0_14] : memref<8x16x128xbf16, #tpu.memory_space<vmem>>, vector<1x16x128xbf16>
    %27 = vector.shape_cast %26 : vector<1x16x128xbf16> to vector<16x128xbf16>
    %28 = arith.truncf %25 : vector<16x128xf32> to vector<16x128xbf16>
    %cst_15 = arith.constant dense<0.000000e+00> : vector<16x128xf32>
    %29 = tpu.matmul %28, %3, %cst_15 {dimension_numbers = #tpu.dot_dimension_numbers<[1], [0], [0], [1], [0, 0, 1, 1], [], []>} : vector<16x128xbf16>, vector<128x128xbf16>, vector<16x128xf32> -> vector<16x128xf32>
    %30 = arith.extf %27 : vector<16x128xbf16> to vector<16x128xf32>
    %31 = arith.addf %30, %29 : vector<16x128xf32>
    %32 = math.tanh %31 : vector<16x128xf32>
    %c4 = arith.constant 4 : index
    %c0_16 = arith.constant 0 : index
    %c0_17 = arith.constant 0 : index
    %33 = vector.load %arg2[%c4, %c0_16, %c0_17] : memref<8x16x128xbf16, #tpu.memory_space<vmem>>, vector<1x16x128xbf16>
    %34 = vector.shape_cast %33 : vector<1x16x128xbf16> to vector<16x128xbf16>
    %35 = arith.truncf %32 : vector<16x128xf32> to vector<16x128xbf16>
    %cst_18 = arith.constant dense<0.000000e+00> : vector<16x128xf32>
    %36 = tpu.matmul %35, %3, %cst_18 {dimension_numbers = #tpu.dot_dimension_numbers<[1], [0], [0], [1], [0, 0, 1, 1], [], []>} : vector<16x128xbf16>, vector<128x128xbf16>, vector<16x128xf32> -> vector<16x128xf32>
    %37 = arith.extf %34 : vector<16x128xbf16> to vector<16x128xf32>
    %38 = arith.addf %37, %36 : vector<16x128xf32>
    %39 = math.tanh %38 : vector<16x128xf32>
    %c5 = arith.constant 5 : index
    %c0_19 = arith.constant 0 : index
    %c0_20 = arith.constant 0 : index
    %40 = vector.load %arg2[%c5, %c0_19, %c0_20] : memref<8x16x128xbf16, #tpu.memory_space<vmem>>, vector<1x16x128xbf16>
    %41 = vector.shape_cast %40 : vector<1x16x128xbf16> to vector<16x128xbf16>
    %42 = arith.truncf %39 : vector<16x128xf32> to vector<16x128xbf16>
    %cst_21 = arith.constant dense<0.000000e+00> : vector<16x128xf32>
    %43 = tpu.matmul %42, %3, %cst_21 {dimension_numbers = #tpu.dot_dimension_numbers<[1], [0], [0], [1], [0, 0, 1, 1], [], []>} : vector<16x128xbf16>, vector<128x128xbf16>, vector<16x128xf32> -> vector<16x128xf32>
    %44 = arith.extf %41 : vector<16x128xbf16> to vector<16x128xf32>
    %45 = arith.addf %44, %43 : vector<16x128xf32>
    %46 = math.tanh %45 : vector<16x128xf32>
    %c6 = arith.constant 6 : index
    %c0_22 = arith.constant 0 : index
    %c0_23 = arith.constant 0 : index
    %47 = vector.load %arg2[%c6, %c0_22, %c0_23] : memref<8x16x128xbf16, #tpu.memory_space<vmem>>, vector<1x16x128xbf16>
    %48 = vector.shape_cast %47 : vector<1x16x128xbf16> to vector<16x128xbf16>
    %49 = arith.truncf %46 : vector<16x128xf32> to vector<16x128xbf16>
    %cst_24 = arith.constant dense<0.000000e+00> : vector<16x128xf32>
    %50 = tpu.matmul %49, %3, %cst_24 {dimension_numbers = #tpu.dot_dimension_numbers<[1], [0], [0], [1], [0, 0, 1, 1], [], []>} : vector<16x128xbf16>, vector<128x128xbf16>, vector<16x128xf32> -> vector<16x128xf32>
    %51 = arith.extf %48 : vector<16x128xbf16> to vector<16x128xf32>
    %52 = arith.addf %51, %50 : vector<16x128xf32>
    %53 = math.tanh %52 : vector<16x128xf32>
    %c7 = arith.constant 7 : index
    %c0_25 = arith.constant 0 : index
    %c0_26 = arith.constant 0 : index
    %54 = vector.load %arg2[%c7, %c0_25, %c0_26] : memref<8x16x128xbf16, #tpu.memory_space<vmem>>, vector<1x16x128xbf16>
    %55 = vector.shape_cast %54 : vector<1x16x128xbf16> to vector<16x128xbf16>
    %56 = arith.truncf %53 : vector<16x128xf32> to vector<16x128xbf16>
    %cst_27 = arith.constant dense<0.000000e+00> : vector<16x128xf32>
    %57 = tpu.matmul %56, %3, %cst_27 {dimension_numbers = #tpu.dot_dimension_numbers<[1], [0], [0], [1], [0, 0, 1, 1], [], []>} : vector<16x128xbf16>, vector<128x128xbf16>, vector<16x128xf32> -> vector<16x128xf32>
    %58 = arith.extf %55 : vector<16x128xbf16> to vector<16x128xf32>
    %59 = arith.addf %58, %57 : vector<16x128xf32>
    %60 = math.tanh %59 : vector<16x128xf32>
    %c0_28 = arith.constant 0 : index
    %c0_29 = arith.constant 0 : index
    %61 = vector.load %arg7[%c0_28, %c0_29] : memref<16x128xf32, #tpu.memory_space<vmem>>, vector<16x128xf32>
    tpu.vector_store %arg7[%c0_28, %c0_29], %60 {strides = array<i32>} : memref<16x128xf32, #tpu.memory_space<vmem>>, vector<16x128xf32>,
    %c0_i32_30 = arith.constant 0 : i32
    %62 = arith.cmpi eq, %arg1, %c0_i32_30 : i32
    %63 = arith.extui %62 : i1 to i32
    %c0_i32_31 = arith.constant 0 : i32
    %64 = arith.cmpi ne, %63, %c0_i32_31 : i32
    scf.if %64 {
      %65 = arith.truncf %60 : vector<16x128xf32> to vector<16x128xbf16>
      %c0_32 = arith.constant 0 : index
      %c0_33 = arith.constant 0 : index
      %66 = vector.load %arg4[%c0_32, %c0_33] : memref<128x128xbf16, #tpu.memory_space<vmem>>, vector<128x128xbf16>
      %cst_34 = arith.constant dense<0.000000e+00> : vector<16x128xf32>
      %67 = tpu.matmul %65, %66, %cst_34 {dimension_numbers = #tpu.dot_dimension_numbers<[1], [0], [0], [1], [0, 0, 1, 1], [], []>} : vector<16x128xbf16>, vector<128x128xbf16>, vector<16x128xf32> -> vector<16x128xf32>
      %c0_35 = arith.constant 0 : index
      %c0_36 = arith.constant 0 : index
      %68 = vector.load %arg5[%c0_35, %c0_36] : memref<1x128xf32, #tpu.memory_space<vmem>>, vector<1x128xf32>
      %69 = vector.broadcast %68 : vector<1x128xf32> to vector<16x128xf32>
      %70 = arith.addf %67, %69 : vector<16x128xf32>
      %c0_37 = arith.constant 0 : index
      %c0_38 = arith.constant 0 : index
      %71 = vector.load %arg6[%c0_37, %c0_38] : memref<16x128xf32, #tpu.memory_space<vmem>>, vector<16x128xf32>
      tpu.vector_store %arg6[%c0_37, %c0_38], %70 {strides = array<i32>} : memref<16x128xf32, #tpu.memory_space<vmem>>, vector<16x128xf32>,
    } else {
    }
    return
  }
  func.func @transform_0(%arg0: i32, %arg1: i32) -> (i32, i32, i32) {
    %c0_i32 = arith.constant 0 : i32
    %c0_i32_0 = arith.constant 0 : i32
    return %arg1, %arg0, %c0_i32 : i32, i32, i32
  }
  func.func @transform_1(%arg0: i32, %arg1: i32) -> (i32, i32) {
    %c0_i32 = arith.constant 0 : i32
    %c0_i32_0 = arith.constant 0 : i32
    %c0_i32_1 = arith.constant 0 : i32
    return %c0_i32, %c0_i32_0 : i32, i32
  }
  func.func @transform_2(%arg0: i32, %arg1: i32) -> (i32, i32) {
    %c0_i32 = arith.constant 0 : i32
    %c0_i32_0 = arith.constant 0 : i32
    %c0_i32_1 = arith.constant 0 : i32
    return %c0_i32, %c0_i32_0 : i32, i32
  }
  func.func @transform_3(%arg0: i32, %arg1: i32) -> (i32, i32) {
    %c0_i32 = arith.constant 0 : i32
    %c0_i32_0 = arith.constant 0 : i32
    %c0_i32_1 = arith.constant 0 : i32
    return %c0_i32, %c0_i32_0 : i32, i32
  }
  func.func @transform_4(%arg0: i32, %arg1: i32) -> (i32, i32) {
    %c0_i32 = arith.constant 0 : i32
    %c0_i32_0 = arith.constant 0 : i32
    return %arg0, %c0_i32 : i32, i32
  }
}

module attributes {stable_mosaic.version = 11 : i64} {
  func.func @rnn_recurrence_kernel(%arg0: i32, %arg1: i32, %arg2: memref<8x16x128xbf16, #tpu.memory_space<vmem>>, %arg3: memref<128x128xbf16, #tpu.memory_space<vmem>>, %arg4: memref<128x128xbf16, #tpu.memory_space<vmem>>, %arg5: memref<1x128xf32, #tpu.memory_space<vmem>>, %arg6: memref<16x128xf32, #tpu.memory_space<vmem>>, %arg7: memref<16x128xf32, #tpu.memory_space<vmem>>) attributes {dimension_semantics = [#tpu.dimension_semantics<parallel>, #tpu.dimension_semantics<arbitrary>], iteration_bounds = array<i64: 1, 1>, scalar_prefetch = 0 : i64, scratch_operands = 1 : i64, tpu.core_type = #tpu.core_type<tc>, window_params = [{transform_indices = @transform_0, window_bounds = array<i64: 8, 16, 128>}, {pipeline_mode = #tpu.pipeline_mode<synchronous>, transform_indices = @transform_1, window_bounds = array<i64: 128, 128>}, {pipeline_mode = #tpu.pipeline_mode<synchronous>, transform_indices = @transform_2, window_bounds = array<i64: 128, 128>}, {pipeline_mode = #tpu.pipeline_mode<synchronous>, transform_indices = @transform_3, window_bounds = array<i64: 1, 128>}, {transform_indices = @transform_4, window_bounds = array<i64: 16, 128>}]} {
    %c0_i32 = arith.constant 0 : i32
    %0 = arith.cmpi eq, %arg1, %c0_i32 : i32
    %1 = arith.extui %0 : i1 to i32
    %c0_i32_0 = arith.constant 0 : i32
    %2 = arith.cmpi ne, %1, %c0_i32_0 : i32
    scf.if %2 {
      %cst_32 = arith.constant 0.000000e+00 : f32
      %65 = vector.broadcast %cst_32 : f32 to vector<16x128xf32>
      %c0_33 = arith.constant 0 : index
      %c0_34 = arith.constant 0 : index
      %66 = vector.load %arg7[%c0_33, %c0_34] : memref<16x128xf32, #tpu.memory_space<vmem>>, vector<16x128xf32>
      tpu.vector_store %arg7[%c0_33, %c0_34], %65 {strides = array<i32>} : memref<16x128xf32, #tpu.memory_space<vmem>>, vector<16x128xf32>,
    } else {
    }
    %c0 = arith.constant 0 : index
    %c0_1 = arith.constant 0 : index
    %3 = vector.load %arg3[%c0, %c0_1] : memref<128x128xbf16, #tpu.memory_space<vmem>>, vector<128x128xbf16>
    %c0_2 = arith.constant 0 : index
    %c0_3 = arith.constant 0 : index
    %4 = vector.load %arg7[%c0_2, %c0_3] : memref<16x128xf32, #tpu.memory_space<vmem>>, vector<16x128xf32>
    %c0_4 = arith.constant 0 : index
    %c0_5 = arith.constant 0 : index
    %c0_6 = arith.constant 0 : index
    %5 = vector.load %arg2[%c0_4, %c0_5, %c0_6] : memref<8x16x128xbf16, #tpu.memory_space<vmem>>, vector<1x16x128xbf16>
    %6 = vector.shape_cast %5 : vector<1x16x128xbf16> to vector<16x128xbf16>
    %7 = arith.truncf %4 : vector<16x128xf32> to vector<16x128xbf16>
    %cst = arith.constant dense<0.000000e+00> : vector<16x128xf32>
    %8 = tpu.matmul %7, %3, %cst {dimension_numbers = #tpu.dot_dimension_numbers<[1], [0], [0], [1], [0, 0, 1, 1], [], []>} : vector<16x128xbf16>, vector<128x128xbf16>, vector<16x128xf32> -> vector<16x128xf32>
    %9 = arith.extf %6 : vector<16x128xbf16> to vector<16x128xf32>
    %10 = arith.addf %9, %8 : vector<16x128xf32>
    %11 = math.tanh %10 : vector<16x128xf32>
    %c1 = arith.constant 1 : index
    %c0_7 = arith.constant 0 : index
    %c0_8 = arith.constant 0 : index
    %12 = vector.load %arg2[%c1, %c0_7, %c0_8] : memref<8x16x128xbf16, #tpu.memory_space<vmem>>, vector<1x16x128xbf16>
    %13 = vector.shape_cast %12 : vector<1x16x128xbf16> to vector<16x128xbf16>
    %14 = arith.truncf %11 : vector<16x128xf32> to vector<16x128xbf16>
    %cst_9 = arith.constant dense<0.000000e+00> : vector<16x128xf32>
    %15 = tpu.matmul %14, %3, %cst_9 {dimension_numbers = #tpu.dot_dimension_numbers<[1], [0], [0], [1], [0, 0, 1, 1], [], []>} : vector<16x128xbf16>, vector<128x128xbf16>, vector<16x128xf32> -> vector<16x128xf32>
    %16 = arith.extf %13 : vector<16x128xbf16> to vector<16x128xf32>
    %17 = arith.addf %16, %15 : vector<16x128xf32>
    %18 = math.tanh %17 : vector<16x128xf32>
    %c2 = arith.constant 2 : index
    %c0_10 = arith.constant 0 : index
    %c0_11 = arith.constant 0 : index
    %19 = vector.load %arg2[%c2, %c0_10, %c0_11] : memref<8x16x128xbf16, #tpu.memory_space<vmem>>, vector<1x16x128xbf16>
    %20 = vector.shape_cast %19 : vector<1x16x128xbf16> to vector<16x128xbf16>
    %21 = arith.truncf %18 : vector<16x128xf32> to vector<16x128xbf16>
    %cst_12 = arith.constant dense<0.000000e+00> : vector<16x128xf32>
    %22 = tpu.matmul %21, %3, %cst_12 {dimension_numbers = #tpu.dot_dimension_numbers<[1], [0], [0], [1], [0, 0, 1, 1], [], []>} : vector<16x128xbf16>, vector<128x128xbf16>, vector<16x128xf32> -> vector<16x128xf32>
    %23 = arith.extf %20 : vector<16x128xbf16> to vector<16x128xf32>
    %24 = arith.addf %23, %22 : vector<16x128xf32>
    %25 = math.tanh %24 : vector<16x128xf32>
    %c3 = arith.constant 3 : index
    %c0_13 = arith.constant 0 : index
    %c0_14 = arith.constant 0 : index
    %26 = vector.load %arg2[%c3, %c0_13, %c0_14] : memref<8x16x128xbf16, #tpu.memory_space<vmem>>, vector<1x16x128xbf16>
    %27 = vector.shape_cast %26 : vector<1x16x128xbf16> to vector<16x128xbf16>
    %28 = arith.truncf %25 : vector<16x128xf32> to vector<16x128xbf16>
    %cst_15 = arith.constant dense<0.000000e+00> : vector<16x128xf32>
    %29 = tpu.matmul %28, %3, %cst_15 {dimension_numbers = #tpu.dot_dimension_numbers<[1], [0], [0], [1], [0, 0, 1, 1], [], []>} : vector<16x128xbf16>, vector<128x128xbf16>, vector<16x128xf32> -> vector<16x128xf32>
    %30 = arith.extf %27 : vector<16x128xbf16> to vector<16x128xf32>
    %31 = arith.addf %30, %29 : vector<16x128xf32>
    %32 = math.tanh %31 : vector<16x128xf32>
    %c4 = arith.constant 4 : index
    %c0_16 = arith.constant 0 : index
    %c0_17 = arith.constant 0 : index
    %33 = vector.load %arg2[%c4, %c0_16, %c0_17] : memref<8x16x128xbf16, #tpu.memory_space<vmem>>, vector<1x16x128xbf16>
    %34 = vector.shape_cast %33 : vector<1x16x128xbf16> to vector<16x128xbf16>
    %35 = arith.truncf %32 : vector<16x128xf32> to vector<16x128xbf16>
    %cst_18 = arith.constant dense<0.000000e+00> : vector<16x128xf32>
    %36 = tpu.matmul %35, %3, %cst_18 {dimension_numbers = #tpu.dot_dimension_numbers<[1], [0], [0], [1], [0, 0, 1, 1], [], []>} : vector<16x128xbf16>, vector<128x128xbf16>, vector<16x128xf32> -> vector<16x128xf32>
    %37 = arith.extf %34 : vector<16x128xbf16> to vector<16x128xf32>
    %38 = arith.addf %37, %36 : vector<16x128xf32>
    %39 = math.tanh %38 : vector<16x128xf32>
    %c5 = arith.constant 5 : index
    %c0_19 = arith.constant 0 : index
    %c0_20 = arith.constant 0 : index
    %40 = vector.load %arg2[%c5, %c0_19, %c0_20] : memref<8x16x128xbf16, #tpu.memory_space<vmem>>, vector<1x16x128xbf16>
    %41 = vector.shape_cast %40 : vector<1x16x128xbf16> to vector<16x128xbf16>
    %42 = arith.truncf %39 : vector<16x128xf32> to vector<16x128xbf16>
    %cst_21 = arith.constant dense<0.000000e+00> : vector<16x128xf32>
    %43 = tpu.matmul %42, %3, %cst_21 {dimension_numbers = #tpu.dot_dimension_numbers<[1], [0], [0], [1], [0, 0, 1, 1], [], []>} : vector<16x128xbf16>, vector<128x128xbf16>, vector<16x128xf32> -> vector<16x128xf32>
    %44 = arith.extf %41 : vector<16x128xbf16> to vector<16x128xf32>
    %45 = arith.addf %44, %43 : vector<16x128xf32>
    %46 = math.tanh %45 : vector<16x128xf32>
    %c6 = arith.constant 6 : index
    %c0_22 = arith.constant 0 : index
    %c0_23 = arith.constant 0 : index
    %47 = vector.load %arg2[%c6, %c0_22, %c0_23] : memref<8x16x128xbf16, #tpu.memory_space<vmem>>, vector<1x16x128xbf16>
    %48 = vector.shape_cast %47 : vector<1x16x128xbf16> to vector<16x128xbf16>
    %49 = arith.truncf %46 : vector<16x128xf32> to vector<16x128xbf16>
    %cst_24 = arith.constant dense<0.000000e+00> : vector<16x128xf32>
    %50 = tpu.matmul %49, %3, %cst_24 {dimension_numbers = #tpu.dot_dimension_numbers<[1], [0], [0], [1], [0, 0, 1, 1], [], []>} : vector<16x128xbf16>, vector<128x128xbf16>, vector<16x128xf32> -> vector<16x128xf32>
    %51 = arith.extf %48 : vector<16x128xbf16> to vector<16x128xf32>
    %52 = arith.addf %51, %50 : vector<16x128xf32>
    %53 = math.tanh %52 : vector<16x128xf32>
    %c7 = arith.constant 7 : index
    %c0_25 = arith.constant 0 : index
    %c0_26 = arith.constant 0 : index
    %54 = vector.load %arg2[%c7, %c0_25, %c0_26] : memref<8x16x128xbf16, #tpu.memory_space<vmem>>, vector<1x16x128xbf16>
    %55 = vector.shape_cast %54 : vector<1x16x128xbf16> to vector<16x128xbf16>
    %56 = arith.truncf %53 : vector<16x128xf32> to vector<16x128xbf16>
    %cst_27 = arith.constant dense<0.000000e+00> : vector<16x128xf32>
    %57 = tpu.matmul %56, %3, %cst_27 {dimension_numbers = #tpu.dot_dimension_numbers<[1], [0], [0], [1], [0, 0, 1, 1], [], []>} : vector<16x128xbf16>, vector<128x128xbf16>, vector<16x128xf32> -> vector<16x128xf32>
    %58 = arith.extf %55 : vector<16x128xbf16> to vector<16x128xf32>
    %59 = arith.addf %58, %57 : vector<16x128xf32>
    %60 = math.tanh %59 : vector<16x128xf32>
    %c0_28 = arith.constant 0 : index
    %c0_29 = arith.constant 0 : index
    %61 = vector.load %arg7[%c0_28, %c0_29] : memref<16x128xf32, #tpu.memory_space<vmem>>, vector<16x128xf32>
    tpu.vector_store %arg7[%c0_28, %c0_29], %60 {strides = array<i32>} : memref<16x128xf32, #tpu.memory_space<vmem>>, vector<16x128xf32>,
    %c0_i32_30 = arith.constant 0 : i32
    %62 = arith.cmpi eq, %arg1, %c0_i32_30 : i32
    %63 = arith.extui %62 : i1 to i32
    %c0_i32_31 = arith.constant 0 : i32
    %64 = arith.cmpi ne, %63, %c0_i32_31 : i32
    scf.if %64 {
      %65 = arith.truncf %60 : vector<16x128xf32> to vector<16x128xbf16>
      %c0_32 = arith.constant 0 : index
      %c0_33 = arith.constant 0 : index
      %66 = vector.load %arg4[%c0_32, %c0_33] : memref<128x128xbf16, #tpu.memory_space<vmem>>, vector<128x128xbf16>
      %cst_34 = arith.constant dense<0.000000e+00> : vector<16x128xf32>
      %67 = tpu.matmul %65, %66, %cst_34 {dimension_numbers = #tpu.dot_dimension_numbers<[1], [0], [0], [1], [0, 0, 1, 1], [], []>} : vector<16x128xbf16>, vector<128x128xbf16>, vector<16x128xf32> -> vector<16x128xf32>
      %c0_35 = arith.constant 0 : index
      %c0_36 = arith.constant 0 : index
      %68 = vector.load %arg5[%c0_35, %c0_36] : memref<1x128xf32, #tpu.memory_space<vmem>>, vector<1x128xf32>
      %69 = vector.broadcast %68 : vector<1x128xf32> to vector<16x128xf32>
      %70 = arith.addf %67, %69 : vector<16x128xf32>
      %c0_37 = arith.constant 0 : index
      %c0_38 = arith.constant 0 : index
      %71 = vector.load %arg6[%c0_37, %c0_38] : memref<16x128xf32, #tpu.memory_space<vmem>>, vector<16x128xf32>
      tpu.vector_store %arg6[%c0_37, %c0_38], %70 {strides = array<i32>} : memref<16x128xf32, #tpu.memory_space<vmem>>, vector<16x128xf32>,
    } else {
    }
    return
  }
  func.func @transform_0(%arg0: i32, %arg1: i32) -> (i32, i32, i32) {
    %c0_i32 = arith.constant 0 : i32
    %c0_i32_0 = arith.constant 0 : i32
    return %arg1, %arg0, %c0_i32 : i32, i32, i32
  }
  func.func @transform_1(%arg0: i32, %arg1: i32) -> (i32, i32) {
    %c0_i32 = arith.constant 0 : i32
    %c0_i32_0 = arith.constant 0 : i32
    %c0_i32_1 = arith.constant 0 : i32
    return %c0_i32, %c0_i32_0 : i32, i32
  }
  func.func @transform_2(%arg0: i32, %arg1: i32) -> (i32, i32) {
    %c0_i32 = arith.constant 0 : i32
    %c0_i32_0 = arith.constant 0 : i32
    %c0_i32_1 = arith.constant 0 : i32
    return %c0_i32, %c0_i32_0 : i32, i32
  }
  func.func @transform_3(%arg0: i32, %arg1: i32) -> (i32, i32) {
    %c0_i32 = arith.constant 0 : i32
    %c0_i32_0 = arith.constant 0 : i32
    %c0_i32_1 = arith.constant 0 : i32
    return %c0_i32, %c0_i32_0 : i32, i32
  }
  func.func @transform_4(%arg0: i32, %arg1: i32) -> (i32, i32) {
    %c0_i32 = arith.constant 0 : i32
    %c0_i32_0 = arith.constant 0 : i32
    return %arg0, %c0_i32 : i32, i32
  }
}

</mosaic_0001>

<bundles_post_ra>
// kernel: rnn_model_forward.1
= control target key start
LH: loop header
LB: loop body
LE: loop exit
PB: predicated region body
PF: predicated region fallthrough
CT: control target
= control target key end

     0   :  { %v1003_v0 = vmov 0.0   ;;  %vm1004_vm0 = vmmov 0   ;;  %v1005_v9 = vmov 0.0|0.0   ;;  %s1282_s1 = inlined_call_operand.vmem [shape: bf16[128,128], index: 1, kind: input, shape index: {}]   ;;  %s1283_s0 = inlined_call_operand.vmem [shape: bf16[8,16,128], index: 0, kind: input, shape index: {}]   ;;  %s1284_s2 = inlined_call_operand.vmem [shape: bf16[128,128], index: 2, kind: input, shape index: {}]   ;;  %s1285_s3 = inlined_call_operand.vmem [shape: f32[1,128], index: 3, kind: input, shape index: {}]   ;;  %s1286_s4 = inlined_call_operand.vmem [shape: f32[16,128], index: 4, kind: output, shape index: {}]  }
   0x1   :  { %772 = vmatprep.subr.bf16.mxu0 %v1003_v0  ;;  %v1035_v1 = vld [vmem:[%s1282_s1] sm:$0xff]   ;;  %788 = vmatprep.mubr.msk.bf16.mxu0 %vm1004_vm0, %v1003_v0  ;;  %v1046_v2 = vld [vmem:[%s1282_s1 + $0x8] sm:$0xff]   ;;  %v1055_v3 = vld [vmem:[%s1282_s1 + $0x10] sm:$0xff]  }
   0x2   :  { %792 = vmatprep.subr.bf16.mxu1 %v1003_v0  ;;  %808 = vmatprep.mubr.msk.bf16.mxu1 %vm1004_vm0, %v1003_v0  ;;  %v1064_v4 = vld [vmem:[%s1282_s1 + $0x18] sm:$0xff]   ;;  %v1073_v5 = vld [vmem:[%s1282_s1 + $0x20] sm:$0xff]   ;;  %v1082_v6 = vld [vmem:[%s1282_s1 + $0x28] sm:$0xff]  }
   0x3   :  { %773 = vmatpush3.bf16.msra.mxu0 %v1035_v1  ;;  %793 = vmatpush3.bf16.msra.mxu1 %v1035_v1  ;;  %v1091_v7 = vld [vmem:[%s1282_s1 + $0x30] sm:$0xff]   ;;  %v1100_v8 = vld [vmem:[%s1282_s1 + $0x38] sm:$0xff]   ;;  %v653_v10 = vld [vmem:[%s1283_s0] sm:$0xff]  }
   0x4   :  { %774 = vmatprep.subr.bf16.mxu0 %v1003_v0  ;;  %794 = vmatprep.subr.bf16.mxu1 %v1003_v0  ;;  %v654_v11 = vunpack.c.l.bf16 %v653_v10  ;;  %v655_v12 = vunpack.c.h.bf16 %v653_v10  ;;  %v684_v22 = vld [vmem:[%s1283_s0 + $0x8] sm:$0xff]   ;;  %v685_v34 = vld [vmem:[%s1283_s0 + $0x10] sm:$0xff]   ;;  %v686_v46 = vld [vmem:[%s1283_s0 + $0x18] sm:$0xff]  }
   0x5   :  { %v658_v23 = vunpack.c.l.bf16 %v684_v22  ;;  %v659_v24 = vunpack.c.h.bf16 %v684_v22  ;;  %v662_v35 = vunpack.c.l.bf16 %v685_v34  ;;  %v663_v36 = vunpack.c.h.bf16 %v685_v34  ;;  %v687_v58 = vld [vmem:[%s1283_s0 + $0x20] sm:$0xff]   ;;  %v966_v22 = vld [vmem:[%s1284_s2 + $0x18] sm:$0xff]  }
   0x6   :  { %v666_v47 = vunpack.c.l.bf16 %v686_v46  ;;  %v667_v48 = vunpack.c.h.bf16 %v686_v46  ;;  %v670_v59 = vunpack.c.l.bf16 %v687_v58  ;;  %v671_v60 = vunpack.c.h.bf16 %v687_v58 }
   0x7   :  { %775 = vmatpush3.bf16.msra.mxu0 %v1046_v2  ;;  %795 = vmatpush3.bf16.msra.mxu1 %v1046_v2 }
   0x8   :  { %776 = vmatprep.subr.bf16.mxu0 %v1003_v0  ;;  %796 = vmatprep.subr.bf16.mxu1 %v1003_v0 }
   0xb   :  { %777 = vmatpush3.bf16.msra.mxu0 %v1055_v3  ;;  %797 = vmatpush3.bf16.msra.mxu1 %v1055_v3 }
   0xc   :  { %778 = vmatprep.subr.bf16.mxu0 %v1003_v0  ;;  %798 = vmatprep.subr.bf16.mxu1 %v1003_v0 }
   0xf   :  { %779 = vmatpush3.bf16.msra.mxu0 %v1064_v4  ;;  %799 = vmatpush3.bf16.msra.mxu1 %v1064_v4 }
  0x10   :  { %780 = vmatprep.subr.bf16.mxu0 %v1003_v0  ;;  %800 = vmatprep.subr.bf16.mxu1 %v1003_v0 }
  0x13   :  { %781 = vmatpush3.bf16.msra.mxu0 %v1073_v5  ;;  %801 = vmatpush3.bf16.msra.mxu1 %v1073_v5 }
  0x14   :  { %782 = vmatprep.subr.bf16.mxu0 %v1003_v0  ;;  %802 = vmatprep.subr.bf16.mxu1 %v1003_v0 }
  0x17   :  { %783 = vmatpush3.bf16.msra.mxu0 %v1082_v6  ;;  %803 = vmatpush3.bf16.msra.mxu1 %v1082_v6 }
  0x18   :  { %784 = vmatprep.subr.bf16.mxu0 %v1003_v0  ;;  %804 = vmatprep.subr.bf16.mxu1 %v1003_v0 }
  0x1b   :  { %785 = vmatpush3.bf16.msra.mxu0 %v1091_v7  ;;  %805 = vmatpush3.bf16.msra.mxu1 %v1091_v7 }
  0x1c   :  { %786 = vmatprep.subr.bf16.mxu0 %v1003_v0  ;;  %806 = vmatprep.subr.bf16.mxu1 %v1003_v0 }
  0x1f   :  { %787 = vmatpush3.bf16.msra.mxu0 %v1100_v8  ;;  %807 = vmatpush3.bf16.msra.mxu1 %v1100_v8 }
  0x20   :  { %812 = vmatprep.subr.bf16.mxu0 %v1003_v0  ;;  %832 = vmatprep.subr.bf16.mxu1 %v1003_v0 }
  0x22   :  { %789 = vmatmul.mubr.bf16.vlgmr.msra.gmra.mrb[0].mxu0 %v1005_v9 }
  0x23   :  { %813 = vmatpush3.bf16.msra.mxu0 %v1035_v1  ;;  %828 = vmatprep.mubr.msk.bf16.mxu0 %vm1004_vm0, %v1003_v0 }
  0x24   :  { %814 = vmatprep.subr.bf16.mxu0 %v1003_v0 }
  0x27   :  { %815 = vmatpush3.bf16.msra.mxu0 %v1046_v2 }
  0x28   :  { %816 = vmatprep.subr.bf16.mxu0 %v1003_v0 }
  0x2b   :  { %817 = vmatpush3.bf16.msra.mxu0 %v1055_v3 }
  0x2c   :  { %818 = vmatprep.subr.bf16.mxu0 %v1003_v0 }
  0x2f   :  { %819 = vmatpush3.bf16.msra.mxu0 %v1064_v4 }
  0x30   :  { %820 = vmatprep.subr.bf16.mxu0 %v1003_v0 }
  0x33   :  { %821 = vmatpush3.bf16.msra.mxu0 %v1073_v5 }
  0x34   :  { %822 = vmatprep.subr.bf16.mxu0 %v1003_v0 }
  0x37   :  { %823 = vmatpush3.bf16.msra.mxu0 %v1082_v6 }
  0x38   :  { %824 = vmatprep.subr.bf16.mxu0 %v1003_v0 }
  0x3b   :  { %825 = vmatpush3.bf16.msra.mxu0 %v1091_v7 }
  0x3c   :  { %826 = vmatprep.subr.bf16.mxu0 %v1003_v0 }
  0x3f   :  { %827 = vmatpush3.bf16.msra.mxu0 %v1100_v8 }
  0x40   :  { %852 = vmatprep.subr.bf16.mxu0 %v1003_v0 }
  0xf5   :  { %v127_v13 = vpop.f32.mrb[0].mxu0 }
  0xf6   :  { %v136_v14 = vadd.f32 %v654_v11, %v127_v13  ;;  %v790_v15 = vpop.f32.mrb[1].mxu0 }
  0xf7   :  { %v130_v16 = vpop.f32.mrb[2].mxu0 }
  0xf8   :  { %v137_v17 = vadd.f32 %v655_v12, %v130_v16  ;;  %v791_v18 = vpop.f32.mrb[3].mxu0  ;;  %971 = vtanh.f32 %v136_v14 }
  0xfa   :  { %973 = vtanh.f32 %v137_v17 }
 0x102   :  { %v972_v19 = vpop.eup %971 }
 0x104   :  { %v974_v20 = vpop.eup %973 }
 0x105   :  { %v143_v21 = vpack.c.bf16 %v974_v20, %v972_v19  ;;  %v964_v20 = vld [vmem:[%s1284_s2 + $0x8] sm:$0xff]  }
 0x107   :  { %809 = vmatmul.mubr.bf16.vlgmr.msra.gmra.mrb[0].mxu1 %v143_v21  ;;  %v965_v21 = vld [vmem:[%s1284_s2 + $0x10] sm:$0xff]  }
 0x108   :  { %833 = vmatpush3.bf16.msra.mxu1 %v1035_v1  ;;  %848 = vmatprep.mubr.msk.bf16.mxu1 %vm1004_vm0, %v1003_v0 }
 0x109   :  { %834 = vmatprep.subr.bf16.mxu1 %v1003_v0 }
 0x10c   :  { %835 = vmatpush3.bf16.msra.mxu1 %v1046_v2 }
 0x10d   :  { %836 = vmatprep.subr.bf16.mxu1 %v1003_v0 }
 0x110   :  { %837 = vmatpush3.bf16.msra.mxu1 %v1055_v3 }
 0x111   :  { %838 = vmatprep.subr.bf16.mxu1 %v1003_v0 }
 0x114   :  { %839 = vmatpush3.bf16.msra.mxu1 %v1064_v4 }
 0x115   :  { %840 = vmatprep.subr.bf16.mxu1 %v1003_v0 }
 0x118   :  { %841 = vmatpush3.bf16.msra.mxu1 %v1073_v5 }
 0x119   :  { %842 = vmatprep.subr.bf16.mxu1 %v1003_v0 }
 0x11c   :  { %843 = vmatpush3.bf16.msra.mxu1 %v1082_v6 }
 0x11d   :  { %844 = vmatprep.subr.bf16.mxu1 %v1003_v0 }
 0x120   :  { %845 = vmatpush3.bf16.msra.mxu1 %v1091_v7 }
 0x121   :  { %846 = vmatprep.subr.bf16.mxu1 %v1003_v0 }
 0x124   :  { %847 = vmatpush3.bf16.msra.mxu1 %v1100_v8 }
 0x125   :  { %872 = vmatprep.subr.bf16.mxu1 %v1003_v0 }
 0x1da   :  { %v178_v25 = vpop.f32.mrb[0].mxu1 }
 0x1db   :  { %v187_v26 = vadd.f32 %v658_v23, %v178_v25  ;;  %v810_v27 = vpop.f32.mrb[1].mxu1  ;;  %v689_v23 = vld [vmem:[%s1283_s0 + $0x30] sm:$0xff]  }
 0x1dc   :  { %v181_v28 = vpop.f32.mrb[2].mxu1  ;;  %v679_v25 = vunpack.c.h.bf16 %v689_v23 }
 0x1dd   :  { %v188_v29 = vadd.f32 %v659_v24, %v181_v28  ;;  %v811_v30 = vpop.f32.mrb[3].mxu1  ;;  %975 = vtanh.f32 %v187_v26  ;;  %v678_v24 = vunpack.c.l.bf16 %v689_v23 }
 0x1df   :  { %977 = vtanh.f32 %v188_v29 }
 0x1e7   :  { %v976_v31 = vpop.eup %975 }
 0x1e9   :  { %v978_v32 = vpop.eup %977 }
 0x1ea   :  { %v194_v33 = vpack.c.bf16 %v978_v32, %v976_v31 }
 0x1ec   :  { %829 = vmatmul.mubr.bf16.vlgmr.msra.gmra.mrb[4].mxu0 %v194_v33 }
 0x1ed   :  { %853 = vmatpush3.bf16.msra.mxu0 %v1035_v1  ;;  %868 = vmatprep.mubr.msk.bf16.mxu0 %vm1004_vm0, %v1003_v0 }
 0x1ee   :  { %854 = vmatprep.subr.bf16.mxu0 %v1003_v0 }
 0x1f1   :  { %855 = vmatpush3.bf16.msra.mxu0 %v1046_v2 }
 0x1f2   :  { %856 = vmatprep.subr.bf16.mxu0 %v1003_v0 }
 0x1f5   :  { %857 = vmatpush3.bf16.msra.mxu0 %v1055_v3 }
 0x1f6   :  { %858 = vmatprep.subr.bf16.mxu0 %v1003_v0 }
 0x1f9   :  { %859 = vmatpush3.bf16.msra.mxu0 %v1064_v4 }
 0x1fa   :  { %860 = vmatprep.subr.bf16.mxu0 %v1003_v0 }
 0x1fd   :  { %861 = vmatpush3.bf16.msra.mxu0 %v1073_v5 }
 0x1fe   :  { %862 = vmatprep.subr.bf16.mxu0 %v1003_v0 }
 0x201   :  { %863 = vmatpush3.bf16.msra.mxu0 %v1082_v6 }
 0x202   :  { %864 = vmatprep.subr.bf16.mxu0 %v1003_v0 }
 0x205   :  { %865 = vmatpush3.bf16.msra.mxu0 %v1091_v7 }
 0x206   :  { %866 = vmatprep.subr.bf16.mxu0 %v1003_v0 }
 0x209   :  { %867 = vmatpush3.bf16.msra.mxu0 %v1100_v8 }
 0x20a   :  { %892 = vmatprep.subr.bf16.mxu0 %v1003_v0 }
 0x2bf   :  { %v229_v37 = vpop.f32.mrb[4].mxu0 }
 0x2c0   :  { %v238_v38 = vadd.f32 %v662_v35, %v229_v37  ;;  %v830_v39 = vpop.f32.mrb[5].mxu0  ;;  %v967_v35 = vld [vmem:[%s1284_s2 + $0x20] sm:$0xff]   ;;  %v969_v37 = vld [vmem:[%s1284_s2 + $0x30] sm:$0xff]  }
 0x2c1   :  { %v232_v40 = vpop.f32.mrb[6].mxu0  ;;  %v690_v39 = vld [vmem:[%s1283_s0 + $0x38] sm:$0xff]  }
 0x2c2   :  { %v239_v41 = vadd.f32 %v663_v36, %v232_v40  ;;  %v831_v42 = vpop.f32.mrb[7].mxu0  ;;  %979 = vtanh.f32 %v238_v38  ;;  %v968_v36 = vld [vmem:[%s1284_s2 + $0x28] sm:$0xff]   ;;  %v970_v38 = vld [vmem:[%s1284_s2 + $0x38] sm:$0xff]   ;;  %v682_v40 = vunpack.c.l.bf16 %v690_v39 }
 0x2c4   :  { %981 = vtanh.f32 %v239_v41  ;;  %v683_v41 = vunpack.c.h.bf16 %v690_v39 }
 0x2cc   :  { %v980_v43 = vpop.eup %979 }
 0x2ce   :  { %v982_v44 = vpop.eup %981 }
 0x2cf   :  { %v245_v45 = vpack.c.bf16 %v982_v44, %v980_v43 }
 0x2d1   :  { %849 = vmatmul.mubr.bf16.vlgmr.msra.gmra.mrb[4].mxu1 %v245_v45 }
 0x2d2   :  { %873 = vmatpush3.bf16.msra.mxu1 %v1035_v1  ;;  %888 = vmatprep.mubr.msk.bf16.mxu1 %vm1004_vm0, %v1003_v0 }
 0x2d3   :  { %874 = vmatprep.subr.bf16.mxu1 %v1003_v0 }
 0x2d6   :  { %875 = vmatpush3.bf16.msra.mxu1 %v1046_v2 }
 0x2d7   :  { %876 = vmatprep.subr.bf16.mxu1 %v1003_v0 }
 0x2da   :  { %877 = vmatpush3.bf16.msra.mxu1 %v1055_v3 }
 0x2db   :  { %878 = vmatprep.subr.bf16.mxu1 %v1003_v0 }
 0x2de   :  { %879 = vmatpush3.bf16.msra.mxu1 %v1064_v4 }
 0x2df   :  { %880 = vmatprep.subr.bf16.mxu1 %v1003_v0 }
 0x2e2   :  { %881 = vmatpush3.bf16.msra.mxu1 %v1073_v5 }
 0x2e3   :  { %882 = vmatprep.subr.bf16.mxu1 %v1003_v0 }
 0x2e6   :  { %883 = vmatpush3.bf16.msra.mxu1 %v1082_v6 }
 0x2e7   :  { %884 = vmatprep.subr.bf16.mxu1 %v1003_v0 }
 0x2ea   :  { %885 = vmatpush3.bf16.msra.mxu1 %v1091_v7 }
 0x2eb   :  { %886 = vmatprep.subr.bf16.mxu1 %v1003_v0 }
 0x2ee   :  { %887 = vmatpush3.bf16.msra.mxu1 %v1100_v8 }
 0x2ef   :  { %912 = vmatprep.subr.bf16.mxu1 %v1003_v0 }
 0x3a4   :  { %v280_v49 = vpop.f32.mrb[4].mxu1 }
 0x3a5   :  { %v289_v50 = vadd.f32 %v666_v47, %v280_v49  ;;  %v850_v51 = vpop.f32.mrb[5].mxu1 }
 0x3a6   :  { %v283_v52 = vpop.f32.mrb[6].mxu1 }
 0x3a7   :  { %v290_v53 = vadd.f32 %v667_v48, %v283_v52  ;;  %v851_v54 = vpop.f32.mrb[7].mxu1  ;;  %983 = vtanh.f32 %v289_v50 }
 0x3a9   :  { %985 = vtanh.f32 %v290_v53 }
 0x3b1   :  { %v984_v55 = vpop.eup %983 }
 0x3b3   :  { %v986_v56 = vpop.eup %985 }
 0x3b4   :  { %v296_v57 = vpack.c.bf16 %v986_v56, %v984_v55 }
 0x3b6   :  { %869 = vmatmul.mubr.bf16.vlgmr.msra.gmra.mrb[8].mxu0 %v296_v57 }
 0x3b7   :  { %893 = vmatpush3.bf16.msra.mxu0 %v1035_v1  ;;  %908 = vmatprep.mubr.msk.bf16.mxu0 %vm1004_vm0, %v1003_v0 }
 0x3b8   :  { %894 = vmatprep.subr.bf16.mxu0 %v1003_v0 }
 0x3bb   :  { %895 = vmatpush3.bf16.msra.mxu0 %v1046_v2 }
 0x3bc   :  { %896 = vmatprep.subr.bf16.mxu0 %v1003_v0 }
 0x3bf   :  { %897 = vmatpush3.bf16.msra.mxu0 %v1055_v3 }
 0x3c0   :  { %898 = vmatprep.subr.bf16.mxu0 %v1003_v0 }
 0x3c3   :  { %899 = vmatpush3.bf16.msra.mxu0 %v1064_v4 }
 0x3c4   :  { %900 = vmatprep.subr.bf16.mxu0 %v1003_v0 }
 0x3c7   :  { %901 = vmatpush3.bf16.msra.mxu0 %v1073_v5 }
 0x3c8   :  { %902 = vmatprep.subr.bf16.mxu0 %v1003_v0 }
 0x3cb   :  { %903 = vmatpush3.bf16.msra.mxu0 %v1082_v6 }
 0x3cc   :  { %904 = vmatprep.subr.bf16.mxu0 %v1003_v0 }
 0x3cf   :  { %905 = vmatpush3.bf16.msra.mxu0 %v1091_v7 }
 0x3d0   :  { %906 = vmatprep.subr.bf16.mxu0 %v1003_v0 }
 0x3d3   :  { %907 = vmatpush3.bf16.msra.mxu0 %v1100_v8 }
 0x3d4   :  { %932 = vmatprep.subr.bf16.mxu0 %v1003_v0 }
 0x489   :  { %v331_v61 = vpop.f32.mrb[8].mxu0 }
 0x48a   :  { %v340_v62 = vadd.f32 %v670_v59, %v331_v61  ;;  %v870_v63 = vpop.f32.mrb[9].mxu0 }
 0x48b   :  { %v334_v9 = vpop.f32.mrb[10].mxu0 }
 0x48c   :  { %v341_v10 = vadd.f32 %v671_v60, %v334_v9  ;;  %v871_v11 = vpop.f32.mrb[11].mxu0  ;;  %987 = vtanh.f32 %v340_v62 }
 0x48e   :  { %989 = vtanh.f32 %v341_v10 }
 0x496   :  { %v988_v12 = vpop.eup %987 }
 0x498   :  { %v990_v13 = vpop.eup %989 }
 0x499   :  { %v347_v14 = vpack.c.bf16 %v990_v13, %v988_v12 }
 0x49b   :  { %889 = vmatmul.mubr.bf16.vlgmr.msra.gmra.mrb[8].mxu1 %v347_v14 }
 0x49c   :  { %913 = vmatpush3.bf16.msra.mxu1 %v1035_v1  ;;  %928 = vmatprep.mubr.msk.bf16.mxu1 %vm1004_vm0, %v1003_v0  ;;  %v688_v1 = vld [vmem:[%s1283_s0 + $0x28] sm:$0xff]  }
 0x49d   :  { %914 = vmatprep.subr.bf16.mxu1 %v1003_v0 }
 0x4a0   :  { %915 = vmatpush3.bf16.msra.mxu1 %v1046_v2  ;;  %v674_v2 = vunpack.c.l.bf16 %v688_v1 }
 0x4a1   :  { %916 = vmatprep.subr.bf16.mxu1 %v1003_v0 }
 0x4a4   :  { %917 = vmatpush3.bf16.msra.mxu1 %v1055_v3  ;;  %v675_v3 = vunpack.c.h.bf16 %v688_v1 }
 0x4a5   :  { %918 = vmatprep.subr.bf16.mxu1 %v1003_v0 }
 0x4a8   :  { %919 = vmatpush3.bf16.msra.mxu1 %v1064_v4 }
 0x4a9   :  { %920 = vmatprep.subr.bf16.mxu1 %v1003_v0 }
 0x4ac   :  { %921 = vmatpush3.bf16.msra.mxu1 %v1073_v5 }
 0x4ad   :  { %922 = vmatprep.subr.bf16.mxu1 %v1003_v0 }
 0x4b0   :  { %923 = vmatpush3.bf16.msra.mxu1 %v1082_v6 }
 0x4b1   :  { %924 = vmatprep.subr.bf16.mxu1 %v1003_v0 }
 0x4b4   :  { %925 = vmatpush3.bf16.msra.mxu1 %v1091_v7 }
 0x4b5   :  { %926 = vmatprep.subr.bf16.mxu1 %v1003_v0 }
 0x4b8   :  { %927 = vmatpush3.bf16.msra.mxu1 %v1100_v8  ;;  %v963_v8 = vld [vmem:[%s1284_s2] sm:$0xff]  }
 0x56e   :  { %v382_v4 = vpop.f32.mrb[8].mxu1 }
 0x56f   :  { %v391_v5 = vadd.f32 %v674_v2, %v382_v4  ;;  %v890_v15 = vpop.f32.mrb[9].mxu1 }
 0x570   :  { %v385_v16 = vpop.f32.mrb[10].mxu1 }
 0x571   :  { %v392_v17 = vadd.f32 %v675_v3, %v385_v16  ;;  %v891_v6 = vpop.f32.mrb[11].mxu1  ;;  %991 = vtanh.f32 %v391_v5 }
 0x573   :  { %993 = vtanh.f32 %v392_v17 }
 0x57b   :  { %v992_v18 = vpop.eup %991 }
 0x57d   :  { %v994_v7 = vpop.eup %993 }
 0x57e   :  { %v398_v19 = vpack.c.bf16 %v994_v7, %v992_v18 }
 0x580   :  { %909 = vmatmul.mubr.bf16.vlgmr.msra.gmra.mrb[12].mxu0 %v398_v19 }
 0x581   :  { %948 = vmatprep.mubr.msk.bf16.mxu0 %vm1004_vm0, %v1003_v0  ;;  %933 = vmatpush3.bf16.msra.mxu0 %v963_v8 }
 0x582   :  { %934 = vmatprep.subr.bf16.mxu0 %v1003_v0 }
 0x585   :  { %935 = vmatpush3.bf16.msra.mxu0 %v964_v20 }
 0x586   :  { %936 = vmatprep.subr.bf16.mxu0 %v1003_v0 }
 0x589   :  { %937 = vmatpush3.bf16.msra.mxu0 %v965_v21 }
 0x58a   :  { %938 = vmatprep.subr.bf16.mxu0 %v1003_v0 }
 0x58d   :  { %939 = vmatpush3.bf16.msra.mxu0 %v966_v22 }
 0x58e   :  { %940 = vmatprep.subr.bf16.mxu0 %v1003_v0 }
 0x591   :  { %941 = vmatpush3.bf16.msra.mxu0 %v967_v35 }
 0x592   :  { %942 = vmatprep.subr.bf16.mxu0 %v1003_v0 }
 0x595   :  { %943 = vmatpush3.bf16.msra.mxu0 %v968_v36 }
 0x596   :  { %944 = vmatprep.subr.bf16.mxu0 %v1003_v0 }
 0x599   :  { %945 = vmatpush3.bf16.msra.mxu0 %v969_v37 }
 0x59a   :  { %946 = vmatprep.subr.bf16.mxu0 %v1003_v0  ;;  %v643_v0 = vld [vmem:[%s1285_s3] ss:$0 sm:$0xff] }
 0x59d   :  { %947 = vmatpush3.bf16.msra.mxu0 %v970_v38 }
 0x653   :  { %v433_v26 = vpop.f32.mrb[12].mxu0 }
 0x654   :  { %v442_v27 = vadd.f32 %v678_v24, %v433_v26  ;;  %v910_v28 = vpop.f32.mrb[13].mxu0 }
 0x655   :  { %v436_v29 = vpop.f32.mrb[14].mxu0 }
 0x656   :  { %v443_v30 = vadd.f32 %v679_v25, %v436_v29  ;;  %v911_v31 = vpop.f32.mrb[15].mxu0  ;;  %995 = vtanh.f32 %v442_v27 }
 0x658   :  { %997 = vtanh.f32 %v443_v30 }
 0x660   :  { %v996_v32 = vpop.eup %995 }
 0x662   :  { %v998_v33 = vpop.eup %997 }
 0x663   :  { %v449_v34 = vpack.c.bf16 %v998_v33, %v996_v32 }
 0x665   :  { %929 = vmatmul.mubr.bf16.vlgmr.msra.gmra.mrb[12].mxu1 %v449_v34 }
 0x738   :  { %v484_v42 = vpop.f32.mrb[12].mxu1 }
 0x739   :  { %v493_v43 = vadd.f32 %v682_v40, %v484_v42  ;;  %v930_v44 = vpop.f32.mrb[13].mxu1 }
 0x73a   :  { %v487_v45 = vpop.f32.mrb[14].mxu1 }
 0x73b   :  { %v494_v46 = vadd.f32 %v683_v41, %v487_v45  ;;  %v931_v47 = vpop.f32.mrb[15].mxu1  ;;  %999 = vtanh.f32 %v493_v43 }
 0x73d   :  { %1001 = vtanh.f32 %v494_v46 }
 0x745   :  { %v1000_v48 = vpop.eup %999 }
 0x747   :  { %v1002_v49 = vpop.eup %1001 }
 0x748   :  { %v502_v50 = vpack.c.bf16 %v1002_v49, %v1000_v48 }
 0x74a   :  { %949 = vmatmul.mubr.bf16.vlgmr.msra.gmra.mrb[16].mxu0 %v502_v50 }
 0x81d   :  { %v608_v51 = vpop.f32.mrb[16].mxu0 }
 0x81e   :  { %v609_v52 = vadd.f32 %v643_v0, %v608_v51  ;;  %v950_v53 = vpop.f32.mrb[17].mxu0 }
 0x81f   :  { %v611_v54 = vpop.f32.mrb[18].mxu0 }
 0x820   :  { %615 = vst [vmem:[%s1286_s4] sm:$0xff] %v609_v52  ;;  %v612_v55 = vadd.f32 %v643_v0, %v611_v54  ;;  %v951_v56 = vpop.f32.mrb[19].mxu0 }
 0x822   :  { %616 = vst [vmem:[%s1286_s4 + $0x8] sm:$0xff] %v612_v55 }

// kernel: rnn_model_forward.1
= control target key start
LH: loop header
LB: loop body
LE: loop exit
PB: predicated region body
PF: predicated region fallthrough
CT: control target
= control target key end

     0   :  { %v1003_v0 = vmov 0.0   ;;  %vm1004_vm0 = vmmov 0   ;;  %v1005_v9 = vmov 0.0|0.0   ;;  %s1282_s1 = inlined_call_operand.vmem [shape: bf16[128,128], index: 1, kind: input, shape index: {}]   ;;  %s1283_s0 = inlined_call_operand.vmem [shape: bf16[8,16,128], index: 0, kind: input, shape index: {}]   ;;  %s1284_s2 = inlined_call_operand.vmem [shape: bf16[128,128], index: 2, kind: input, shape index: {}]   ;;  %s1285_s3 = inlined_call_operand.vmem [shape: f32[1,128], index: 3, kind: input, shape index: {}]   ;;  %s1286_s4 = inlined_call_operand.vmem [shape: f32[16,128], index: 4, kind: output, shape index: {}]  }
   0x1   :  { %772 = vmatprep.subr.bf16.mxu0 %v1003_v0  ;;  %v1035_v1 = vld [vmem:[%s1282_s1] sm:$0xff]   ;;  %788 = vmatprep.mubr.msk.bf16.mxu0 %vm1004_vm0, %v1003_v0  ;;  %v1046_v2 = vld [vmem:[%s1282_s1 + $0x8] sm:$0xff]   ;;  %v1055_v3 = vld [vmem:[%s1282_s1 + $0x10] sm:$0xff]  }
   0x2   :  { %792 = vmatprep.subr.bf16.mxu1 %v1003_v0  ;;  %808 = vmatprep.mubr.msk.bf16.mxu1 %vm1004_vm0, %v1003_v0  ;;  %v1064_v4 = vld [vmem:[%s1282_s1 + $0x18] sm:$0xff]   ;;  %v1073_v5 = vld [vmem:[%s1282_s1 + $0x20] sm:$0xff]   ;;  %v1082_v6 = vld [vmem:[%s1282_s1 + $0x28] sm:$0xff]  }
   0x3   :  { %773 = vmatpush3.bf16.msra.mxu0 %v1035_v1  ;;  %793 = vmatpush3.bf16.msra.mxu1 %v1035_v1  ;;  %v1091_v7 = vld [vmem:[%s1282_s1 + $0x30] sm:$0xff]   ;;  %v1100_v8 = vld [vmem:[%s1282_s1 + $0x38] sm:$0xff]   ;;  %v653_v10 = vld [vmem:[%s1283_s0] sm:$0xff]  }
   0x4   :  { %774 = vmatprep.subr.bf16.mxu0 %v1003_v0  ;;  %794 = vmatprep.subr.bf16.mxu1 %v1003_v0  ;;  %v654_v11 = vunpack.c.l.bf16 %v653_v10  ;;  %v655_v12 = vunpack.c.h.bf16 %v653_v10  ;;  %v684_v22 = vld [vmem:[%s1283_s0 + $0x8] sm:$0xff]   ;;  %v685_v34 = vld [vmem:[%s1283_s0 + $0x10] sm:$0xff]   ;;  %v686_v46 = vld [vmem:[%s1283_s0 + $0x18] sm:$0xff]  }
   0x5   :  { %v658_v23 = vunpack.c.l.bf16 %v684_v22  ;;  %v659_v24 = vunpack.c.h.bf16 %v684_v22  ;;  %v662_v35 = vunpack.c.l.bf16 %v685_v34  ;;  %v663_v36 = vunpack.c.h.bf16 %v685_v34  ;;  %v687_v58 = vld [vmem:[%s1283_s0 + $0x20] sm:$0xff]   ;;  %v966_v22 = vld [vmem:[%s1284_s2 + $0x18] sm:$0xff]  }
   0x6   :  { %v666_v47 = vunpack.c.l.bf16 %v686_v46  ;;  %v667_v48 = vunpack.c.h.bf16 %v686_v46  ;;  %v670_v59 = vunpack.c.l.bf16 %v687_v58  ;;  %v671_v60 = vunpack.c.h.bf16 %v687_v58 }
   0x7   :  { %775 = vmatpush3.bf16.msra.mxu0 %v1046_v2  ;;  %795 = vmatpush3.bf16.msra.mxu1 %v1046_v2 }
   0x8   :  { %776 = vmatprep.subr.bf16.mxu0 %v1003_v0  ;;  %796 = vmatprep.subr.bf16.mxu1 %v1003_v0 }
   0xb   :  { %777 = vmatpush3.bf16.msra.mxu0 %v1055_v3  ;;  %797 = vmatpush3.bf16.msra.mxu1 %v1055_v3 }
   0xc   :  { %778 = vmatprep.subr.bf16.mxu0 %v1003_v0  ;;  %798 = vmatprep.subr.bf16.mxu1 %v1003_v0 }
   0xf   :  { %779 = vmatpush3.bf16.msra.mxu0 %v1064_v4  ;;  %799 = vmatpush3.bf16.msra.mxu1 %v1064_v4 }
  0x10   :  { %780 = vmatprep.subr.bf16.mxu0 %v1003_v0  ;;  %800 = vmatprep.subr.bf16.mxu1 %v1003_v0 }
  0x13   :  { %781 = vmatpush3.bf16.msra.mxu0 %v1073_v5  ;;  %801 = vmatpush3.bf16.msra.mxu1 %v1073_v5 }
  0x14   :  { %782 = vmatprep.subr.bf16.mxu0 %v1003_v0  ;;  %802 = vmatprep.subr.bf16.mxu1 %v1003_v0 }
  0x17   :  { %783 = vmatpush3.bf16.msra.mxu0 %v1082_v6  ;;  %803 = vmatpush3.bf16.msra.mxu1 %v1082_v6 }
  0x18   :  { %784 = vmatprep.subr.bf16.mxu0 %v1003_v0  ;;  %804 = vmatprep.subr.bf16.mxu1 %v1003_v0 }
  0x1b   :  { %785 = vmatpush3.bf16.msra.mxu0 %v1091_v7  ;;  %805 = vmatpush3.bf16.msra.mxu1 %v1091_v7 }
  0x1c   :  { %786 = vmatprep.subr.bf16.mxu0 %v1003_v0  ;;  %806 = vmatprep.subr.bf16.mxu1 %v1003_v0 }
  0x1f   :  { %787 = vmatpush3.bf16.msra.mxu0 %v1100_v8  ;;  %807 = vmatpush3.bf16.msra.mxu1 %v1100_v8 }
  0x20   :  { %812 = vmatprep.subr.bf16.mxu0 %v1003_v0  ;;  %832 = vmatprep.subr.bf16.mxu1 %v1003_v0 }
  0x22   :  { %789 = vmatmul.mubr.bf16.vlgmr.msra.gmra.mrb[0].mxu0 %v1005_v9 }
  0x23   :  { %813 = vmatpush3.bf16.msra.mxu0 %v1035_v1  ;;  %828 = vmatprep.mubr.msk.bf16.mxu0 %vm1004_vm0, %v1003_v0 }
  0x24   :  { %814 = vmatprep.subr.bf16.mxu0 %v1003_v0 }
  0x27   :  { %815 = vmatpush3.bf16.msra.mxu0 %v1046_v2 }
  0x28   :  { %816 = vmatprep.subr.bf16.mxu0 %v1003_v0 }
  0x2b   :  { %817 = vmatpush3.bf16.msra.mxu0 %v1055_v3 }
  0x2c   :  { %818 = vmatprep.subr.bf16.mxu0 %v1003_v0 }
  0x2f   :  { %819 = vmatpush3.bf16.msra.mxu0 %v1064_v4 }
  0x30   :  { %820 = vmatprep.subr.bf16.mxu0 %v1003_v0 }
  0x33   :  { %821 = vmatpush3.bf16.msra.mxu0 %v1073_v5 }
  0x34   :  { %822 = vmatprep.subr.bf16.mxu0 %v1003_v0 }
  0x37   :  { %823 = vmatpush3.bf16.msra.mxu0 %v1082_v6 }
  0x38   :  { %824 = vmatprep.subr.bf16.mxu0 %v1003_v0 }
  0x3b   :  { %825 = vmatpush3.bf16.msra.mxu0 %v1091_v7 }
  0x3c   :  { %826 = vmatprep.subr.bf16.mxu0 %v1003_v0 }
  0x3f   :  { %827 = vmatpush3.bf16.msra.mxu0 %v1100_v8 }
  0x40   :  { %852 = vmatprep.subr.bf16.mxu0 %v1003_v0 }
  0xf5   :  { %v127_v13 = vpop.f32.mrb[0].mxu0 }
  0xf6   :  { %v136_v14 = vadd.f32 %v654_v11, %v127_v13  ;;  %v790_v15 = vpop.f32.mrb[1].mxu0 }
  0xf7   :  { %v130_v16 = vpop.f32.mrb[2].mxu0 }
  0xf8   :  { %v137_v17 = vadd.f32 %v655_v12, %v130_v16  ;;  %v791_v18 = vpop.f32.mrb[3].mxu0  ;;  %971 = vtanh.f32 %v136_v14 }
  0xfa   :  { %973 = vtanh.f32 %v137_v17 }
 0x102   :  { %v972_v19 = vpop.eup %971 }
 0x104   :  { %v974_v20 = vpop.eup %973 }
 0x105   :  { %v143_v21 = vpack.c.bf16 %v974_v20, %v972_v19  ;;  %v964_v20 = vld [vmem:[%s1284_s2 + $0x8] sm:$0xff]  }
 0x107   :  { %809 = vmatmul.mubr.bf16.vlgmr.msra.gmra.mrb[0].mxu1 %v143_v21  ;;  %v965_v21 = vld [vmem:[%s1284_s2 + $0x10] sm:$0xff]  }
 0x108   :  { %833 = vmatpush3.bf16.msra.mxu1 %v1035_v1  ;;  %848 = vmatprep.mubr.msk.bf16.mxu1 %vm1004_vm0, %v1003_v0 }
 0x109   :  { %834 = vmatprep.subr.bf16.mxu1 %v1003_v0 }
 0x10c   :  { %835 = vmatpush3.bf16.msra.mxu1 %v1046_v2 }
 0x10d   :  { %836 = vmatprep.subr.bf16.mxu1 %v1003_v0 }
 0x110   :  { %837 = vmatpush3.bf16.msra.mxu1 %v1055_v3 }
 0x111   :  { %838 = vmatprep.subr.bf16.mxu1 %v1003_v0 }
 0x114   :  { %839 = vmatpush3.bf16.msra.mxu1 %v1064_v4 }
 0x115   :  { %840 = vmatprep.subr.bf16.mxu1 %v1003_v0 }
 0x118   :  { %841 = vmatpush3.bf16.msra.mxu1 %v1073_v5 }
 0x119   :  { %842 = vmatprep.subr.bf16.mxu1 %v1003_v0 }
 0x11c   :  { %843 = vmatpush3.bf16.msra.mxu1 %v1082_v6 }
 0x11d   :  { %844 = vmatprep.subr.bf16.mxu1 %v1003_v0 }
 0x120   :  { %845 = vmatpush3.bf16.msra.mxu1 %v1091_v7 }
 0x121   :  { %846 = vmatprep.subr.bf16.mxu1 %v1003_v0 }
 0x124   :  { %847 = vmatpush3.bf16.msra.mxu1 %v1100_v8 }
 0x125   :  { %872 = vmatprep.subr.bf16.mxu1 %v1003_v0 }
 0x1da   :  { %v178_v25 = vpop.f32.mrb[0].mxu1 }
 0x1db   :  { %v187_v26 = vadd.f32 %v658_v23, %v178_v25  ;;  %v810_v27 = vpop.f32.mrb[1].mxu1  ;;  %v689_v23 = vld [vmem:[%s1283_s0 + $0x30] sm:$0xff]  }
 0x1dc   :  { %v181_v28 = vpop.f32.mrb[2].mxu1  ;;  %v679_v25 = vunpack.c.h.bf16 %v689_v23 }
 0x1dd   :  { %v188_v29 = vadd.f32 %v659_v24, %v181_v28  ;;  %v811_v30 = vpop.f32.mrb[3].mxu1  ;;  %975 = vtanh.f32 %v187_v26  ;;  %v678_v24 = vunpack.c.l.bf16 %v689_v23 }
 0x1df   :  { %977 = vtanh.f32 %v188_v29 }
 0x1e7   :  { %v976_v31 = vpop.eup %975 }
 0x1e9   :  { %v978_v32 = vpop.eup %977 }
 0x1ea   :  { %v194_v33 = vpack.c.bf16 %v978_v32, %v976_v31 }
 0x1ec   :  { %829 = vmatmul.mubr.bf16.vlgmr.msra.gmra.mrb[4].mxu0 %v194_v33 }
 0x1ed   :  { %853 = vmatpush3.bf16.msra.mxu0 %v1035_v1  ;;  %868 = vmatprep.mubr.msk.bf16.mxu0 %vm1004_vm0, %v1003_v0 }
 0x1ee   :  { %854 = vmatprep.subr.bf16.mxu0 %v1003_v0 }
 0x1f1   :  { %855 = vmatpush3.bf16.msra.mxu0 %v1046_v2 }
 0x1f2   :  { %856 = vmatprep.subr.bf16.mxu0 %v1003_v0 }
 0x1f5   :  { %857 = vmatpush3.bf16.msra.mxu0 %v1055_v3 }
 0x1f6   :  { %858 = vmatprep.subr.bf16.mxu0 %v1003_v0 }
 0x1f9   :  { %859 = vmatpush3.bf16.msra.mxu0 %v1064_v4 }
 0x1fa   :  { %860 = vmatprep.subr.bf16.mxu0 %v1003_v0 }
 0x1fd   :  { %861 = vmatpush3.bf16.msra.mxu0 %v1073_v5 }
 0x1fe   :  { %862 = vmatprep.subr.bf16.mxu0 %v1003_v0 }
 0x201   :  { %863 = vmatpush3.bf16.msra.mxu0 %v1082_v6 }
 0x202   :  { %864 = vmatprep.subr.bf16.mxu0 %v1003_v0 }
 0x205   :  { %865 = vmatpush3.bf16.msra.mxu0 %v1091_v7 }
 0x206   :  { %866 = vmatprep.subr.bf16.mxu0 %v1003_v0 }
 0x209   :  { %867 = vmatpush3.bf16.msra.mxu0 %v1100_v8 }
 0x20a   :  { %892 = vmatprep.subr.bf16.mxu0 %v1003_v0 }
 0x2bf   :  { %v229_v37 = vpop.f32.mrb[4].mxu0 }
 0x2c0   :  { %v238_v38 = vadd.f32 %v662_v35, %v229_v37  ;;  %v830_v39 = vpop.f32.mrb[5].mxu0  ;;  %v967_v35 = vld [vmem:[%s1284_s2 + $0x20] sm:$0xff]   ;;  %v969_v37 = vld [vmem:[%s1284_s2 + $0x30] sm:$0xff]  }
 0x2c1   :  { %v232_v40 = vpop.f32.mrb[6].mxu0  ;;  %v690_v39 = vld [vmem:[%s1283_s0 + $0x38] sm:$0xff]  }
 0x2c2   :  { %v239_v41 = vadd.f32 %v663_v36, %v232_v40  ;;  %v831_v42 = vpop.f32.mrb[7].mxu0  ;;  %979 = vtanh.f32 %v238_v38  ;;  %v968_v36 = vld [vmem:[%s1284_s2 + $0x28] sm:$0xff]   ;;  %v970_v38 = vld [vmem:[%s1284_s2 + $0x38] sm:$0xff]   ;;  %v682_v40 = vunpack.c.l.bf16 %v690_v39 }
 0x2c4   :  { %981 = vtanh.f32 %v239_v41  ;;  %v683_v41 = vunpack.c.h.bf16 %v690_v39 }
 0x2cc   :  { %v980_v43 = vpop.eup %979 }
 0x2ce   :  { %v982_v44 = vpop.eup %981 }
 0x2cf   :  { %v245_v45 = vpack.c.bf16 %v982_v44, %v980_v43 }
 0x2d1   :  { %849 = vmatmul.mubr.bf16.vlgmr.msra.gmra.mrb[4].mxu1 %v245_v45 }
 0x2d2   :  { %873 = vmatpush3.bf16.msra.mxu1 %v1035_v1  ;;  %888 = vmatprep.mubr.msk.bf16.mxu1 %vm1004_vm0, %v1003_v0 }
 0x2d3   :  { %874 = vmatprep.subr.bf16.mxu1 %v1003_v0 }
 0x2d6   :  { %875 = vmatpush3.bf16.msra.mxu1 %v1046_v2 }
 0x2d7   :  { %876 = vmatprep.subr.bf16.mxu1 %v1003_v0 }
 0x2da   :  { %877 = vmatpush3.bf16.msra.mxu1 %v1055_v3 }
 0x2db   :  { %878 = vmatprep.subr.bf16.mxu1 %v1003_v0 }
 0x2de   :  { %879 = vmatpush3.bf16.msra.mxu1 %v1064_v4 }
 0x2df   :  { %880 = vmatprep.subr.bf16.mxu1 %v1003_v0 }
 0x2e2   :  { %881 = vmatpush3.bf16.msra.mxu1 %v1073_v5 }
 0x2e3   :  { %882 = vmatprep.subr.bf16.mxu1 %v1003_v0 }
 0x2e6   :  { %883 = vmatpush3.bf16.msra.mxu1 %v1082_v6 }
 0x2e7   :  { %884 = vmatprep.subr.bf16.mxu1 %v1003_v0 }
 0x2ea   :  { %885 = vmatpush3.bf16.msra.mxu1 %v1091_v7 }
 0x2eb   :  { %886 = vmatprep.subr.bf16.mxu1 %v1003_v0 }
 0x2ee   :  { %887 = vmatpush3.bf16.msra.mxu1 %v1100_v8 }
 0x2ef   :  { %912 = vmatprep.subr.bf16.mxu1 %v1003_v0 }
 0x3a4   :  { %v280_v49 = vpop.f32.mrb[4].mxu1 }
 0x3a5   :  { %v289_v50 = vadd.f32 %v666_v47, %v280_v49  ;;  %v850_v51 = vpop.f32.mrb[5].mxu1 }
 0x3a6   :  { %v283_v52 = vpop.f32.mrb[6].mxu1 }
 0x3a7   :  { %v290_v53 = vadd.f32 %v667_v48, %v283_v52  ;;  %v851_v54 = vpop.f32.mrb[7].mxu1  ;;  %983 = vtanh.f32 %v289_v50 }
 0x3a9   :  { %985 = vtanh.f32 %v290_v53 }
 0x3b1   :  { %v984_v55 = vpop.eup %983 }
 0x3b3   :  { %v986_v56 = vpop.eup %985 }
 0x3b4   :  { %v296_v57 = vpack.c.bf16 %v986_v56, %v984_v55 }
 0x3b6   :  { %869 = vmatmul.mubr.bf16.vlgmr.msra.gmra.mrb[8].mxu0 %v296_v57 }
 0x3b7   :  { %893 = vmatpush3.bf16.msra.mxu0 %v1035_v1  ;;  %908 = vmatprep.mubr.msk.bf16.mxu0 %vm1004_vm0, %v1003_v0 }
 0x3b8   :  { %894 = vmatprep.subr.bf16.mxu0 %v1003_v0 }
 0x3bb   :  { %895 = vmatpush3.bf16.msra.mxu0 %v1046_v2 }
 0x3bc   :  { %896 = vmatprep.subr.bf16.mxu0 %v1003_v0 }
 0x3bf   :  { %897 = vmatpush3.bf16.msra.mxu0 %v1055_v3 }
 0x3c0   :  { %898 = vmatprep.subr.bf16.mxu0 %v1003_v0 }
 0x3c3   :  { %899 = vmatpush3.bf16.msra.mxu0 %v1064_v4 }
 0x3c4   :  { %900 = vmatprep.subr.bf16.mxu0 %v1003_v0 }
 0x3c7   :  { %901 = vmatpush3.bf16.msra.mxu0 %v1073_v5 }
 0x3c8   :  { %902 = vmatprep.subr.bf16.mxu0 %v1003_v0 }
 0x3cb   :  { %903 = vmatpush3.bf16.msra.mxu0 %v1082_v6 }
 0x3cc   :  { %904 = vmatprep.subr.bf16.mxu0 %v1003_v0 }
 0x3cf   :  { %905 = vmatpush3.bf16.msra.mxu0 %v1091_v7 }
 0x3d0   :  { %906 = vmatprep.subr.bf16.mxu0 %v1003_v0 }
 0x3d3   :  { %907 = vmatpush3.bf16.msra.mxu0 %v1100_v8 }
 0x3d4   :  { %932 = vmatprep.subr.bf16.mxu0 %v1003_v0 }
 0x489   :  { %v331_v61 = vpop.f32.mrb[8].mxu0 }
 0x48a   :  { %v340_v62 = vadd.f32 %v670_v59, %v331_v61  ;;  %v870_v63 = vpop.f32.mrb[9].mxu0 }
 0x48b   :  { %v334_v9 = vpop.f32.mrb[10].mxu0 }
 0x48c   :  { %v341_v10 = vadd.f32 %v671_v60, %v334_v9  ;;  %v871_v11 = vpop.f32.mrb[11].mxu0  ;;  %987 = vtanh.f32 %v340_v62 }
 0x48e   :  { %989 = vtanh.f32 %v341_v10 }
 0x496   :  { %v988_v12 = vpop.eup %987 }
 0x498   :  { %v990_v13 = vpop.eup %989 }
 0x499   :  { %v347_v14 = vpack.c.bf16 %v990_v13, %v988_v12 }
 0x49b   :  { %889 = vmatmul.mubr.bf16.vlgmr.msra.gmra.mrb[8].mxu1 %v347_v14 }
 0x49c   :  { %913 = vmatpush3.bf16.msra.mxu1 %v1035_v1  ;;  %928 = vmatprep.mubr.msk.bf16.mxu1 %vm1004_vm0, %v1003_v0  ;;  %v688_v1 = vld [vmem:[%s1283_s0 + $0x28] sm:$0xff]  }
 0x49d   :  { %914 = vmatprep.subr.bf16.mxu1 %v1003_v0 }
 0x4a0   :  { %915 = vmatpush3.bf16.msra.mxu1 %v1046_v2  ;;  %v674_v2 = vunpack.c.l.bf16 %v688_v1 }
 0x4a1   :  { %916 = vmatprep.subr.bf16.mxu1 %v1003_v0 }
 0x4a4   :  { %917 = vmatpush3.bf16.msra.mxu1 %v1055_v3  ;;  %v675_v3 = vunpack.c.h.bf16 %v688_v1 }
 0x4a5   :  { %918 = vmatprep.subr.bf16.mxu1 %v1003_v0 }
 0x4a8   :  { %919 = vmatpush3.bf16.msra.mxu1 %v1064_v4 }
 0x4a9   :  { %920 = vmatprep.subr.bf16.mxu1 %v1003_v0 }
 0x4ac   :  { %921 = vmatpush3.bf16.msra.mxu1 %v1073_v5 }
 0x4ad   :  { %922 = vmatprep.subr.bf16.mxu1 %v1003_v0 }
 0x4b0   :  { %923 = vmatpush3.bf16.msra.mxu1 %v1082_v6 }
 0x4b1   :  { %924 = vmatprep.subr.bf16.mxu1 %v1003_v0 }
 0x4b4   :  { %925 = vmatpush3.bf16.msra.mxu1 %v1091_v7 }
 0x4b5   :  { %926 = vmatprep.subr.bf16.mxu1 %v1003_v0 }
 0x4b8   :  { %927 = vmatpush3.bf16.msra.mxu1 %v1100_v8  ;;  %v963_v8 = vld [vmem:[%s1284_s2] sm:$0xff]  }
 0x56e   :  { %v382_v4 = vpop.f32.mrb[8].mxu1 }
 0x56f   :  { %v391_v5 = vadd.f32 %v674_v2, %v382_v4  ;;  %v890_v15 = vpop.f32.mrb[9].mxu1 }
 0x570   :  { %v385_v16 = vpop.f32.mrb[10].mxu1 }
 0x571   :  { %v392_v17 = vadd.f32 %v675_v3, %v385_v16  ;;  %v891_v6 = vpop.f32.mrb[11].mxu1  ;;  %991 = vtanh.f32 %v391_v5 }
 0x573   :  { %993 = vtanh.f32 %v392_v17 }
 0x57b   :  { %v992_v18 = vpop.eup %991 }
 0x57d   :  { %v994_v7 = vpop.eup %993 }
 0x57e   :  { %v398_v19 = vpack.c.bf16 %v994_v7, %v992_v18 }
 0x580   :  { %909 = vmatmul.mubr.bf16.vlgmr.msra.gmra.mrb[12].mxu0 %v398_v19 }
 0x581   :  { %948 = vmatprep.mubr.msk.bf16.mxu0 %vm1004_vm0, %v1003_v0  ;;  %933 = vmatpush3.bf16.msra.mxu0 %v963_v8 }
 0x582   :  { %934 = vmatprep.subr.bf16.mxu0 %v1003_v0 }
 0x585   :  { %935 = vmatpush3.bf16.msra.mxu0 %v964_v20 }
 0x586   :  { %936 = vmatprep.subr.bf16.mxu0 %v1003_v0 }
 0x589   :  { %937 = vmatpush3.bf16.msra.mxu0 %v965_v21 }
 0x58a   :  { %938 = vmatprep.subr.bf16.mxu0 %v1003_v0 }
 0x58d   :  { %939 = vmatpush3.bf16.msra.mxu0 %v966_v22 }
 0x58e   :  { %940 = vmatprep.subr.bf16.mxu0 %v1003_v0 }
 0x591   :  { %941 = vmatpush3.bf16.msra.mxu0 %v967_v35 }
 0x592   :  { %942 = vmatprep.subr.bf16.mxu0 %v1003_v0 }
 0x595   :  { %943 = vmatpush3.bf16.msra.mxu0 %v968_v36 }
 0x596   :  { %944 = vmatprep.subr.bf16.mxu0 %v1003_v0 }
 0x599   :  { %945 = vmatpush3.bf16.msra.mxu0 %v969_v37 }
 0x59a   :  { %946 = vmatprep.subr.bf16.mxu0 %v1003_v0  ;;  %v643_v0 = vld [vmem:[%s1285_s3] ss:$0 sm:$0xff] }
 0x59d   :  { %947 = vmatpush3.bf16.msra.mxu0 %v970_v38 }
 0x653   :  { %v433_v26 = vpop.f32.mrb[12].mxu0 }
 0x654   :  { %v442_v27 = vadd.f32 %v678_v24, %v433_v26  ;;  %v910_v28 = vpop.f32.mrb[13].mxu0 }
 0x655   :  { %v436_v29 = vpop.f32.mrb[14].mxu0 }
 0x656   :  { %v443_v30 = vadd.f32 %v679_v25, %v436_v29  ;;  %v911_v31 = vpop.f32.mrb[15].mxu0  ;;  %995 = vtanh.f32 %v442_v27 }
 0x658   :  { %997 = vtanh.f32 %v443_v30 }
 0x660   :  { %v996_v32 = vpop.eup %995 }
 0x662   :  { %v998_v33 = vpop.eup %997 }
 0x663   :  { %v449_v34 = vpack.c.bf16 %v998_v33, %v996_v32 }
 0x665   :  { %929 = vmatmul.mubr.bf16.vlgmr.msra.gmra.mrb[12].mxu1 %v449_v34 }
 0x738   :  { %v484_v42 = vpop.f32.mrb[12].mxu1 }
 0x739   :  { %v493_v43 = vadd.f32 %v682_v40, %v484_v42  ;;  %v930_v44 = vpop.f32.mrb[13].mxu1 }
 0x73a   :  { %v487_v45 = vpop.f32.mrb[14].mxu1 }
 0x73b   :  { %v494_v46 = vadd.f32 %v683_v41, %v487_v45  ;;  %v931_v47 = vpop.f32.mrb[15].mxu1  ;;  %999 = vtanh.f32 %v493_v43 }
 0x73d   :  { %1001 = vtanh.f32 %v494_v46 }
 0x745   :  { %v1000_v48 = vpop.eup %999 }
 0x747   :  { %v1002_v49 = vpop.eup %1001 }
 0x748   :  { %v502_v50 = vpack.c.bf16 %v1002_v49, %v1000_v48 }
 0x74a   :  { %949 = vmatmul.mubr.bf16.vlgmr.msra.gmra.mrb[16].mxu0 %v502_v50 }
 0x81d   :  { %v608_v51 = vpop.f32.mrb[16].mxu0 }
 0x81e   :  { %v609_v52 = vadd.f32 %v643_v0, %v608_v51  ;;  %v950_v53 = vpop.f32.mrb[17].mxu0 }
 0x81f   :  { %v611_v54 = vpop.f32.mrb[18].mxu0 }
 0x820   :  { %615 = vst [vmem:[%s1286_s4] sm:$0xff] %v609_v52  ;;  %v612_v55 = vadd.f32 %v643_v0, %v611_v54  ;;  %v951_v56 = vpop.f32.mrb[19].mxu0 }
 0x822   :  { %616 = vst [vmem:[%s1286_s4 + $0x8] sm:$0xff] %v612_v55 }

</bundles_post_ra>
